<compile_context>
chip_gen: v7x
topology: tpu7x:2x2x1
jax: 0.10.0
libtpu: 0.0.40
codegen_flags: <defaults>
</compile_context>

<pallas_src>
import math

import numpy as np
import jax
import jax.numpy as jnp
from jax.experimental import pallas as pl
from jax.experimental.pallas import tpu as pltpu


def make_pe_table(embed_dim, max_len=100):
    """Sinusoidal table, identical to PositionalEncoding.__init__ (a buffer)."""
    pe = np.zeros((max_len, embed_dim), np.float32)
    position = np.arange(max_len, dtype=np.float32)[:, None]
    div_term = np.exp(np.arange(0, embed_dim, 2, dtype=np.float32)
                      * -(math.log(10000.0) / embed_dim))
    pe[:, 0::2] = np.sin(position * div_term)
    pe[:, 1::2] = np.cos(position * div_term)
    return jnp.asarray(pe)                                  # (max_len, D) f32


def _pe_broadcast_kernel(pe_ref, o_ref):
    # pe_ref: (tt, N*D) lane-dense PE slab for this time tile (batch-invariant).
    # o_ref : (tb, tt, N*D) output block spanning tb batch elements.
    o_ref[...] = jnp.broadcast_to(pe_ref[...][None, :, :], o_ref.shape)


def _divisors_desc(n):
    return [d for d in range(n, 0, -1) if n % d == 0]


def _pick_tiles(B, T, row_bytes, budget_bytes=8 << 20):
    """Largest (tb, tt) divisor tiles whose double-buffered blocks fit budget.

    VMEM use per grid step (auto double-buffering of in and out blocks):
        2 * tt * row_bytes  +  2 * tb * tt * row_bytes
    The sublane block dim (tt) must equal T or be a multiple of 8 (the (8,128)
    tiling rule); the leading batch dim tb is unconstrained."""
    tt = T
    for d in _divisors_desc(T):
        if (d == T or d % 8 == 0) and 4 * d * row_bytes <= budget_bytes:
            tt = d
            break
    tb = 1
    for d in _divisors_desc(B):
        if 2 * (d + 1) * tt * row_bytes <= budget_bytes:
            tb = d
            break
    return tb, tt


def positional_encoding(x, pe_table):
    """Pallas equivalent of PositionalEncoding.forward.

    x: (B, T, N, D) -- only its shape is used (expand_as semantics).
    Returns an f32 array of shape x.shape with out[b, t, n, :] = pe_table[t, :].
    """
    B, T, N, D = x.shape
    max_len, d_pe = pe_table.shape
    assert D == d_pe, (D, d_pe)
    assert T <= max_len, f"sequence length T={T} exceeds PE max_len={max_len}"

    # Lane-dense (T, N*D) slab built once outside the kernel (wrapper-side
    # layout plumbing, 1/B of the output bytes); the kernel does the batch
    # expand and all of the output HBM writes.
    pe_slab = jnp.reshape(
        jnp.broadcast_to(pe_table[:T][:, None, :], (T, N, D)), (T, N * D))

    tb, tt = _pick_tiles(B, T, N * D * 4)
    grid = (B // tb, T // tt)

    out_flat = pl.pallas_call(
        _pe_broadcast_kernel,
        out_shape=jax.ShapeDtypeStruct((B, T, N * D), jnp.float32),
        grid=grid,
        in_specs=[
            # PE block index ignores the batch grid axis -> reused across B.
            pl.BlockSpec((tt, N * D), lambda b, t: (t, 0)),
        ],
        out_specs=pl.BlockSpec((tb, tt, N * D), lambda b, t: (b, t, 0)),
        compiler_params=pltpu.CompilerParams(
            dimension_semantics=("parallel", "parallel")),
    )(pe_slab)

    return out_flat.reshape(B, T, N, D)


if __name__ == "__main__":
    # Shapes consistent with PDFormer's use of PositionalEncoding:
    # x is (batch, time, num_nodes, embed_dim).
    B, T, N, D = 2, 6, 10, 32
    key = jax.random.PRNGKey(0)
    # x values are never read (expand_as only uses the shape), matching PyTorch.
    x = jax.random.normal(key, (B, T, N, D), jnp.float32)

    pe_table = make_pe_table(embed_dim=D, max_len=100)

    fwd = jax.jit(positional_encoding)
    out = jax.block_until_ready(fwd(x, pe_table))

    assert out.shape == x.shape, (out.shape, x.shape)
    # Pure-JAX reference of pe[:, :T].unsqueeze(2).expand_as(x)
    ref = jnp.broadcast_to(pe_table[:T][None, :, None, :], (B, T, N, D))
    assert bool(jnp.all(out == ref)), float(jnp.max(jnp.abs(out - ref)))
    assert bool(jnp.all(jnp.isfinite(out)))
    print("KERNEL_OK")
</pallas_src>

<mosaic_0001>
module attributes {stable_mosaic.version = 11 : i64} {
  func.func @_pe_broadcast_kernel(%arg0: i32, %arg1: i32, %arg2: memref<6x320xf32, #tpu.memory_space<vmem>>, %arg3: memref<2x6x320xf32, #tpu.memory_space<vmem>>) attributes {dimension_semantics = [#tpu.dimension_semantics<parallel>, #tpu.dimension_semantics<parallel>], iteration_bounds = array<i64: 1, 1>, scalar_prefetch = 0 : i64, scratch_operands = 0 : i64, tpu.core_type = #tpu.core_type<tc>, window_params = [{transform_indices = @transform_0, window_bounds = array<i64: 6, 320>}, {transform_indices = @transform_1, window_bounds = array<i64: 2, 6, 320>}]} {
    %c0 = arith.constant 0 : index
    %c0_0 = arith.constant 0 : index
    %0 = vector.load %arg2[%c0, %c0_0] : memref<6x320xf32, #tpu.memory_space<vmem>>, vector<6x320xf32>
    %1 = vector.shape_cast %0 : vector<6x320xf32> to vector<1x6x320xf32>
    %2 = vector.shape_cast %1 : vector<1x6x320xf32> to vector<1x6x320xf32>
    %3 = vector.broadcast %2 : vector<1x6x320xf32> to vector<2x6x320xf32>
    %c0_1 = arith.constant 0 : index
    %c0_2 = arith.constant 0 : index
    %c0_3 = arith.constant 0 : index
    %4 = vector.load %arg3[%c0_1, %c0_2, %c0_3] : memref<2x6x320xf32, #tpu.memory_space<vmem>>, vector<2x6x320xf32>
    tpu.vector_store %arg3[%c0_1, %c0_2, %c0_3], %3 {strides = array<i32>} : memref<2x6x320xf32, #tpu.memory_space<vmem>>, vector<2x6x320xf32>,
    return
  }
  func.func @transform_0(%arg0: i32, %arg1: i32) -> (i32, i32) {
    %c0_i32 = arith.constant 0 : i32
    %c0_i32_0 = arith.constant 0 : i32
    return %arg1, %c0_i32 : i32, i32
  }
  func.func @transform_1(%arg0: i32, %arg1: i32) -> (i32, i32, i32) {
    %c0_i32 = arith.constant 0 : i32
    %c0_i32_0 = arith.constant 0 : i32
    return %arg0, %arg1, %c0_i32 : i32, i32, i32
  }
}

</mosaic_0001>

<bundles_post_ra>
// kernel: positional_encoding.1
= control target key start
LH: loop header
LB: loop body
LE: loop exit
PB: predicated region body
PF: predicated region fallthrough
CT: control target
= control target key end

     0   :  { %vm13_vm0 = vcmask 521216   ;;  %s59_s0 = inlined_call_operand.vmem [shape: f32[6,320], index: 0, kind: input, shape index: {}]   ;;  %s60_s1 = inlined_call_operand.vmem [shape: f32[2,6,320], index: 1, kind: output, shape index: {}]  }
   0x1   :  { %v8_v0 = vld [vmem:[%s59_s0] sm:$0x3f]  ;;  %v9_v1 = vld [vmem:[%s59_s0 + $0x8] sm:$0x3f]  ;;  %v10_v2 = vld [vmem:[%s59_s0 + $0x10] sm:$0x3f] }
   0x2   :  { %11 = vst [vmem:[%s60_s1] sm:$0x3f] %v8_v0  ;;  %15 = vst [vmem:[%s60_s1 + $0x18] sm:$0x3f] %v8_v0 }
   0x3   :  { %12 = vst [vmem:[%s60_s1 + $0x8] sm:$0x3f] %v9_v1  ;;  %16 = vst [vmem:[%s60_s1 + $0x20] sm:$0x3f] %v9_v1 }
   0x4   :  { %14 = vst.msk [vmem:[%s60_s1 + $0x10] sm:$0x3f] %vm13_vm0, %v10_v2  ;;  %17 = vst.msk [vmem:[%s60_s1 + $0x28] sm:$0x3f] %vm13_vm0, %v10_v2 }

</bundles_post_ra>
